<compile_context>
chip_gen: v7x
topology: tpu7x:2x2x1
jax: 0.10.0
libtpu: 0.0.40
codegen_flags: <defaults>
</compile_context>

<pallas_src>
import functools

import jax
import jax.numpy as jnp
from jax.experimental import pallas as pl
from jax.experimental.pallas import tpu as pltpu


# ----------------------------- kernel bodies ------------------------------


def _fc12(x, w1, b1, w2, b2, use_bf16):
    """fc1+ReLU, fc2+ReLU. Operands may be bf16 (pre-cast in the wrapper);
    accumulation and the bias/ReLU epilogue are always f32."""
    h1 = jnp.dot(x, w1, preferred_element_type=jnp.float32)
    h1 = jnp.maximum(h1 + b1, 0.0)
    h1 = h1.astype(jnp.bfloat16) if use_bf16 else h1
    h2 = jnp.dot(h1, w2, preferred_element_type=jnp.float32)
    return jnp.maximum(h2 + b2, 0.0)


def _fc3_row(h2, w3_row, b3_scalar):
    """N=1 head: VPU multiply + lane reduction (never a 1-column MXU matmul).
    The (tile_b, 1) result is transposed to a lane-dense (1, tile_b) row
    before the store (XLU slot is otherwise idle here)."""
    y_col = jnp.sum(h2 * w3_row, axis=-1, keepdims=True) + b3_scalar  # (tile_b, 1)
    return jnp.transpose(y_col)                                       # (1, tile_b)


def _eval_kernel(x_ref, w1_ref, b1_ref, w2_ref, b2_ref, w3r_ref, b3_ref, o_ref,
                 *, use_bf16):
    h2 = _fc12(x_ref[...], w1_ref[...], b1_ref[...], w2_ref[...], b2_ref[...],
               use_bf16)
    o_ref[...] = _fc3_row(h2, w3r_ref[...], b3_ref[0, 0]).astype(o_ref.dtype)


def _train_kernel(x_ref, bits_ref, w1_ref, b1_ref, w2_ref, b2_ref, w3r_ref,
                  b3_ref, o_ref, *, keep_threshold, inv_keep, use_bf16):
    h2 = _fc12(x_ref[...], w1_ref[...], b1_ref[...], w2_ref[...], b2_ref[...],
               use_bf16)
    # Fused dropout-as-select: no f32 mask temporary is ever built.
    bits = bits_ref[...].astype(jnp.int32)              # uint8 -> 0..255
    h2 = jnp.where(bits < keep_threshold, h2 * inv_keep, 0.0)
    o_ref[...] = _fc3_row(h2, w3r_ref[...], b3_ref[0, 0]).astype(o_ref.dtype)


# ------------------------------- helpers -----------------------------------


def _dropout_bits(key, batch, num_hidden):
    """Packed uint8 randomness for the dropout mask (4x smaller than f32)."""
    return jax.random.bits(key, (batch, num_hidden), dtype=jnp.uint8)


def _pick_tile_b(B, max_rows=512):
    """Prefer ONE grid step (v5e/v6e have a single TC; each extra step is
    ~600 cycles of pure serial overhead).  Only split for large B, and then in
    lane-aligned tiles (multiples of 128) so the lane-dense (1, tile_b) output
    block and the uint8 bits tile stay layout-legal."""
    if B <= max_rows:
        return B
    upper = (min(max_rows, B // 2) // 128) * 128
    for cand in range(upper, 127, -128):
        if B % cand == 0:
            return cand
    return B


# ------------------------------- wrapper -----------------------------------


@functools.partial(
    jax.jit,
    static_argnames=("apply_dropout", "keep_prob", "use_bf16_matmul", "tile_b"))
def preference_learner_forward(x, params, dropout_key=None, *,
                               apply_dropout=False, keep_prob=0.5,
                               use_bf16_matmul=False, tile_b=None):
    """x: (B, input_size) f32.  Returns (B, 1) f32.

    apply_dropout=True  -> training + use_dropout path; `dropout_key` fixes the
    mask (pass the same key to reproduce it, i.e. regen_mask=False reuse).
    """
    w1, b1, w2, b2, w3_row, b3 = params
    B, in_dim = x.shape
    H = w1.shape[1]

    if tile_b is None:
        tile_b = _pick_tile_b(B)
    assert B % tile_b == 0
    num_tiles = B // tile_b
    assert tile_b == B or tile_b % 128 == 0, \
        "tile_b must equal B or be a multiple of 128 (lane-dense output tile)"
    grid = (num_tiles,)

    if use_bf16_matmul:
        # Cast once here (not per grid step inside the kernel): halves weight
        # HBM traffic / VMEM residency; f32 accumulation keeps accuracy.  Safe
        # (and faster) on v5e as well -- its MXU is bf16-native.
        x = x.astype(jnp.bfloat16)
        w1 = w1.astype(jnp.bfloat16)
        w2 = w2.astype(jnp.bfloat16)

    # Weight/bias blocks never change across the grid -> single-buffer them
    # when the grid actually has more than one step.
    resident_mode = pl.Buffered(1) if num_tiles > 1 else None

    def resident(shape):
        return pl.BlockSpec(shape, lambda i: (0, 0), pipeline_mode=resident_mode)

    x_spec = pl.BlockSpec((tile_b, in_dim), lambda i: (i, 0))
    bits_spec = pl.BlockSpec((tile_b, H), lambda i: (i, 0))
    w_specs = [resident((in_dim, H)),   # W1 (in, out)
               resident((1, H)),        # b1
               resident((H, H)),        # W2 (in, out)
               resident((1, H)),        # b2
               resident((1, H))]        # W3 as a (1, H) row
    b3_spec = pl.BlockSpec(memory_space=pltpu.MemorySpace.SMEM)   # b3 scalar

    # Lane-dense y: (1, B) row written as (1, tile_b) blocks; reshaped below.
    out_spec = pl.BlockSpec((1, tile_b), lambda i: (0, i))
    out_shape = jax.ShapeDtypeStruct((1, B), jnp.float32)

    # Explicit scoped-VMEM budget (only ever raises the default): resident
    # weights (single-buffered when num_tiles > 1) + streamed x / bits / y
    # tiles (double-buffered) + h1/h2 intermediates + headroom.
    wbytes = 2 if use_bf16_matmul else 4
    weight_bytes = (in_dim * H + H * H) * wbytes + 3 * H * 4 + 1024
    weight_bytes *= 1 if num_tiles > 1 else 2
    stream_bytes = 2 * (tile_b * in_dim * wbytes + tile_b * 4)
    if apply_dropout:
        stream_bytes += 2 * tile_b * H
    vmem_limit = int(max(32 << 20,
                         weight_bytes + stream_bytes + 2 * tile_b * H * 4
                         + (4 << 20)))
    cparams = pltpu.CompilerParams(dimension_semantics=("parallel",),
                                   vmem_limit_bytes=vmem_limit)

    flops = 2 * B * (in_dim * H + H * H + H)
    bytes_accessed = int(x.size * x.dtype.itemsize
                         + w1.size * w1.dtype.itemsize
                         + w2.size * w2.dtype.itemsize
                         + 4 * (b1.size + b2.size + w3_row.size + b3.size + B))
    if apply_dropout:
        bytes_accessed += B * H                      # uint8 dropout bits
    cost = pl.CostEstimate(flops=flops, transcendentals=0,
                           bytes_accessed=bytes_accessed)

    if not apply_dropout:
        y_row = pl.pallas_call(
            functools.partial(_eval_kernel, use_bf16=use_bf16_matmul),
            out_shape=out_shape,
            grid_spec=pltpu.PrefetchScalarGridSpec(
                num_scalar_prefetch=0, grid=grid,
                in_specs=[x_spec] + w_specs + [b3_spec],
                out_specs=out_spec),
            compiler_params=cparams,
            cost_estimate=cost,
        )(x, w1, b1, w2, b2, w3_row, b3)
        return y_row.reshape(B, 1)

    assert dropout_key is not None, "apply_dropout=True needs a dropout_key"
    # keep probability is quantised to 1/256 (exact for the module's p=0.5).
    keep_threshold = int(round(keep_prob * 256))
    bits = _dropout_bits(dropout_key, B, H)
    y_row = pl.pallas_call(
        functools.partial(_train_kernel, keep_threshold=keep_threshold,
                          inv_keep=float(1.0 / keep_prob),
                          use_bf16=use_bf16_matmul),
        out_shape=out_shape,
        grid_spec=pltpu.PrefetchScalarGridSpec(
            num_scalar_prefetch=0, grid=grid,
            in_specs=[x_spec, bits_spec] + w_specs + [b3_spec],
            out_specs=out_spec),
        compiler_params=cparams,
        cost_estimate=cost,
    )(x, bits, w1, b1, w2, b2, w3_row, b3)
    return y_row.reshape(B, 1)


# ----------------------------- params / ref --------------------------------


def init_params(key, input_size, num_hidden):
    """nn.Linear-style init; biases zeroed (the module multiplies them by 0)."""
    k1, k2, k3 = jax.random.split(key, 3)

    def uni(k, shape, fan_in):
        bound = 1.0 / jnp.sqrt(fan_in)
        return jax.random.uniform(k, shape, jnp.float32, -bound, bound)

    w1 = uni(k1, (input_size, num_hidden), input_size)   # (in, out)
    b1 = jnp.zeros((1, num_hidden), jnp.float32)
    w2 = uni(k2, (num_hidden, num_hidden), num_hidden)   # (in, out)
    b2 = jnp.zeros((1, num_hidden), jnp.float32)
    w3_row = uni(k3, (1, num_hidden), num_hidden)        # PyTorch layout (1, H)
    b3 = jnp.zeros((1, 1), jnp.float32)
    return (w1, b1, w2, b2, w3_row, b3)


def _reference_forward(x, params, mask=None):
    w1, b1, w2, b2, w3_row, b3 = params
    h1 = jnp.maximum(x @ w1 + b1, 0.0)
    h2 = jnp.maximum(h1 @ w2 + b2, 0.0)
    if mask is not None:
        h2 = h2 * mask
    return h2 @ w3_row.T + b3


# --------------------------------- demo ------------------------------------


if __name__ == "__main__":
    key = jax.random.PRNGKey(0)
    k_param, k_x, k_drop = jax.random.split(key, 3)

    batch, input_size, num_hidden = 8, 32, 32
    params = init_params(k_param, input_size, num_hidden)
    x = jax.random.normal(k_x, (batch, input_size), jnp.float32)

    # Eval path (module.eval() or use_dropout=False): no dropout anywhere.
    y_eval = jax.block_until_ready(preference_learner_forward(x, params))
    ref = _reference_forward(x, params)
    assert y_eval.shape == (batch, 1)
    assert jnp.allclose(y_eval, ref, atol=1e-5, rtol=1e-5)

    # Training path with dropout: packed uint8 bits from the key, fused select
    # in-kernel.  Reference rebuilt from the same bits.
    y_drop = jax.block_until_ready(preference_learner_forward(
        x, params, k_drop, apply_dropout=True))
    bits = _dropout_bits(k_drop, batch, num_hidden)
    mask = jnp.where(bits.astype(jnp.int32) < 128,
                     jnp.float32(2.0), jnp.float32(0.0))   # inverted dropout, p=0.5
    assert 0.0 < float(jnp.mean(mask == 0.0)) < 1.0        # randomness actually fired
    ref_drop = _reference_forward(x, params, mask)
    assert jnp.allclose(y_drop, ref_drop, atol=1e-5, rtol=1e-5)

    # Same key -> same mask (regen_mask=False reuse); tile/grid independent.
    y_drop2 = jax.block_until_ready(preference_learner_forward(
        x, params, k_drop, apply_dropout=True))
    assert jnp.allclose(y_drop2, y_drop, atol=1e-6, rtol=1e-6)

    # bf16 MXU-operand path (safe on v5e/v6e/v7x): f32 accumulation, looser tol.
    y_bf16 = jax.block_until_ready(preference_learner_forward(
        x, params, use_bf16_matmul=True))
    assert jnp.allclose(y_bf16, ref, atol=1e-1, rtol=1e-1)

    print("KERNEL_OK")
</pallas_src>

<mosaic_0001>
module attributes {stable_mosaic.version = 11 : i64} {
  func.func @_eval_kernel(%arg0: i32, %arg1: memref<8x32xf32, #tpu.memory_space<vmem>>, %arg2: memref<32x32xf32, #tpu.memory_space<vmem>>, %arg3: memref<1x32xf32, #tpu.memory_space<vmem>>, %arg4: memref<32x32xf32, #tpu.memory_space<vmem>>, %arg5: memref<1x32xf32, #tpu.memory_space<vmem>>, %arg6: memref<1x32xf32, #tpu.memory_space<vmem>>, %arg7: memref<1x1xf32, #tpu.memory_space<smem>>, %arg8: memref<1x8xf32, #tpu.memory_space<vmem>>) attributes {dimension_semantics = [#tpu.dimension_semantics<parallel>], iteration_bounds = array<i64: 1>, scalar_prefetch = 0 : i64, scratch_operands = 0 : i64, tpu.core_type = #tpu.core_type<tc>, window_params = [{transform_indices = @transform_0, window_bounds = array<i64: 8, 32>}, {pipeline_mode = #tpu.pipeline_mode<synchronous>, transform_indices = @transform_1, window_bounds = array<i64: 32, 32>}, {pipeline_mode = #tpu.pipeline_mode<synchronous>, transform_indices = @transform_2, window_bounds = array<i64: 1, 32>}, {pipeline_mode = #tpu.pipeline_mode<synchronous>, transform_indices = @transform_3, window_bounds = array<i64: 32, 32>}, {pipeline_mode = #tpu.pipeline_mode<synchronous>, transform_indices = @transform_4, window_bounds = array<i64: 1, 32>}, {pipeline_mode = #tpu.pipeline_mode<synchronous>, transform_indices = @transform_5, window_bounds = array<i64: 1, 32>}, {transform_indices = @transform_6, window_bounds = array<i64: 1, 1>}, {transform_indices = @transform_7, window_bounds = array<i64: 1, 8>}]} {
    %c0 = arith.constant 0 : index
    %c0_0 = arith.constant 0 : index
    %0 = vector.load %arg1[%c0, %c0_0] : memref<8x32xf32, #tpu.memory_space<vmem>>, vector<8x32xf32>
    %c0_1 = arith.constant 0 : index
    %c0_2 = arith.constant 0 : index
    %1 = vector.load %arg2[%c0_1, %c0_2] : memref<32x32xf32, #tpu.memory_space<vmem>>, vector<32x32xf32>
    %c0_3 = arith.constant 0 : index
    %c0_4 = arith.constant 0 : index
    %2 = vector.load %arg3[%c0_3, %c0_4] : memref<1x32xf32, #tpu.memory_space<vmem>>, vector<1x32xf32>
    %c0_5 = arith.constant 0 : index
    %c0_6 = arith.constant 0 : index
    %3 = vector.load %arg4[%c0_5, %c0_6] : memref<32x32xf32, #tpu.memory_space<vmem>>, vector<32x32xf32>
    %c0_7 = arith.constant 0 : index
    %c0_8 = arith.constant 0 : index
    %4 = vector.load %arg5[%c0_7, %c0_8] : memref<1x32xf32, #tpu.memory_space<vmem>>, vector<1x32xf32>
    %cst = arith.constant dense<0.000000e+00> : vector<8x32xf32>
    %5 = tpu.matmul %0, %1, %cst {dimension_numbers = #tpu.dot_dimension_numbers<[1], [0], [0], [1], [0, 0, 1, 1], [], []>} : vector<8x32xf32>, vector<32x32xf32>, vector<8x32xf32> -> vector<8x32xf32>
    %6 = vector.broadcast %2 : vector<1x32xf32> to vector<8x32xf32>
    %7 = arith.addf %5, %6 : vector<8x32xf32>
    %cst_9 = arith.constant 0.000000e+00 : f32
    %8 = vector.broadcast %cst_9 : f32 to vector<8x32xf32>
    %9 = arith.maximumf %7, %8 : vector<8x32xf32>
    %cst_10 = arith.constant dense<0.000000e+00> : vector<8x32xf32>
    %10 = tpu.matmul %9, %3, %cst_10 {dimension_numbers = #tpu.dot_dimension_numbers<[1], [0], [0], [1], [0, 0, 1, 1], [], []>} : vector<8x32xf32>, vector<32x32xf32>, vector<8x32xf32> -> vector<8x32xf32>
    %11 = vector.broadcast %4 : vector<1x32xf32> to vector<8x32xf32>
    %12 = arith.addf %10, %11 : vector<8x32xf32>
    %cst_11 = arith.constant 0.000000e+00 : f32
    %13 = vector.broadcast %cst_11 : f32 to vector<8x32xf32>
    %14 = arith.maximumf %12, %13 : vector<8x32xf32>
    %c0_12 = arith.constant 0 : index
    %c0_13 = arith.constant 0 : index
    %15 = vector.load %arg6[%c0_12, %c0_13] : memref<1x32xf32, #tpu.memory_space<vmem>>, vector<1x32xf32>
    %c0_14 = arith.constant 0 : index
    %c0_15 = arith.constant 0 : index
    %16 = memref.load %arg7[%c0_14, %c0_15] : memref<1x1xf32, #tpu.memory_space<smem>>
    %17 = vector.broadcast %15 : vector<1x32xf32> to vector<8x32xf32>
    %18 = arith.mulf %14, %17 : vector<8x32xf32>
    %cst_16 = arith.constant dense<0.000000e+00> : vector<8xf32>
    %19 = vector.multi_reduction <add>, %18, %cst_16 [1] : vector<8x32xf32> to vector<8xf32>
    %20 = vector.shape_cast %19 : vector<8xf32> to vector<8x1xf32>
    %21 = vector.broadcast %16 : f32 to vector<8x1xf32>
    %22 = arith.addf %20, %21 : vector<8x1xf32>
    %23 = tpu.transpose %22, [1, 0] : vector<8x1xf32> -> vector<1x8xf32>
    %c0_17 = arith.constant 0 : index
    %c0_18 = arith.constant 0 : index
    %24 = vector.load %arg8[%c0_17, %c0_18] : memref<1x8xf32, #tpu.memory_space<vmem>>, vector<1x8xf32>
    tpu.vector_store %arg8[%c0_17, %c0_18], %23 {strides = array<i32>} : memref<1x8xf32, #tpu.memory_space<vmem>>, vector<1x8xf32>,
    return
  }
  func.func @transform_0(%arg0: i32) -> (i32, i32) {
    %c0_i32 = arith.constant 0 : i32
    %c0_i32_0 = arith.constant 0 : i32
    return %arg0, %c0_i32 : i32, i32
  }
  func.func @transform_1(%arg0: i32) -> (i32, i32) {
    %c0_i32 = arith.constant 0 : i32
    %c0_i32_0 = arith.constant 0 : i32
    %c0_i32_1 = arith.constant 0 : i32
    return %c0_i32, %c0_i32_0 : i32, i32
  }
  func.func @transform_2(%arg0: i32) -> (i32, i32) {
    %c0_i32 = arith.constant 0 : i32
    %c0_i32_0 = arith.constant 0 : i32
    %c0_i32_1 = arith.constant 0 : i32
    return %c0_i32, %c0_i32_0 : i32, i32
  }
  func.func @transform_3(%arg0: i32) -> (i32, i32) {
    %c0_i32 = arith.constant 0 : i32
    %c0_i32_0 = arith.constant 0 : i32
    %c0_i32_1 = arith.constant 0 : i32
    return %c0_i32, %c0_i32_0 : i32, i32
  }
  func.func @transform_4(%arg0: i32) -> (i32, i32) {
    %c0_i32 = arith.constant 0 : i32
    %c0_i32_0 = arith.constant 0 : i32
    %c0_i32_1 = arith.constant 0 : i32
    return %c0_i32, %c0_i32_0 : i32, i32
  }
  func.func @transform_5(%arg0: i32) -> (i32, i32) {
    %c0_i32 = arith.constant 0 : i32
    %c0_i32_0 = arith.constant 0 : i32
    %c0_i32_1 = arith.constant 0 : i32
    return %c0_i32, %c0_i32_0 : i32, i32
  }
  func.func @transform_6(%arg0: i32) -> (i32, i32) {
    %c0_i32 = arith.constant 0 : i32
    %c0_i32_0 = arith.constant 0 : i32
    %c0_i32_1 = arith.constant 0 : i32
    return %c0_i32, %c0_i32_0 : i32, i32
  }
  func.func @transform_7(%arg0: i32) -> (i32, i32) {
    %c0_i32 = arith.constant 0 : i32
    %c0_i32_0 = arith.constant 0 : i32
    return %c0_i32, %arg0 : i32, i32
  }
}

</mosaic_0001>

<bundles_post_ra>
// kernel: preference_learner_forward.1
= control target key start
LH: loop header
LB: loop body
LE: loop exit
PB: predicated region body
PF: predicated region fallthrough
CT: control target
= control target key end

     0   :  { %13 = vsyncpa [#allocation4], 0  ;;  %s573_s0 = inlined_call_operand.hbm [shape: f32[8,32], index: 0, kind: input, shape index: {}]   ;;  %s574_s1 = inlined_call_operand.hbm [shape: f32[32,32], index: 1, kind: input, shape index: {}]   ;;  %s575_s2 = inlined_call_operand.vmem [shape: f32[1,32], index: 2, kind: input, shape index: {}]   ;;  %s576_s3 = inlined_call_operand.hbm [shape: f32[32,32], index: 3, kind: input, shape index: {}]   ;;  %s577_s4 = inlined_call_operand.vmem [shape: f32[1,32], index: 4, kind: input, shape index: {}]   ;;  %s578_s5 = inlined_call_operand.vmem [shape: f32[1,32], index: 5, kind: input, shape index: {}]   ;;  %s579_s6 = inlined_call_operand.<no memory space> [shape: f32[1,1], index: 6, kind: input, shape index: {}]   ;;  %s580_s7 = inlined_call_operand.hbm [shape: f32[1,8], index: 7, kind: output, shape index: {}]  }
   0x1   :  { %14 = vsyncpa [#allocation7], 0 }
   0x2   :  { %15 = vsyncpa [#allocation5], 0  ;;  %s455_s24 = smov [#allocation6]   ;;  %s361_s28 = scalar_lea.hbm %s574_s1, 512 }
   0x3   :  { %s31_s25 = sshll.u32 %s455_s24, 4  ;;  %p362_p0 = scmp.ne.s32.totalorder %s574_s1, %s361_s28  ;;  %s32_s25 = int_to_ptr.vmem [resolvable:$true] %s31_s25 }
   0x4   :  { %p365_p1 = scmp.lt.u32.totalorder %s361_s28, %s574_s1 }
   0x6   :  { %p367_p2 = pnand %p365_p1, %p362_p0 }
   0x8   :  { %370 = shalt.err (!%p367_p2)
}
   0x9   :  { %s371_s10 = scalar_lea.vmem %s32_s25, 512  ;;  %p376_p4 = scmp.lt.s32.totalorder %s32_s25, %s32_s25 }
   0xa   :  { %p372_p3 = scmp.ne.s32.totalorder %s32_s25, %s371_s10  ;;  %p377_p5 = scmp.lt.s32.totalorder %s371_s10, %s371_s10 }
   0xc   :  { %p378_p6 = por %p377_p5, %p376_p4 }
   0xe   :  { %p379_p7 = pnand %p378_p6, %p372_p3 }
  0x10   :  { %382 = shalt.err (!%p379_p7)
}
  0x11   :  { %s456_s11 = smov 128   ;;  %s457_s12 = smov 8  }
  0x12   :  { %37 = dma.hbm_to_vmem [thread:$0]  %s574_s1, 512, %s32_s25, [#allocation7], %s456_s11, %s456_s11, %s457_s12  }
  0x13   :  { %s458_s15 = smov [#allocation3]   ;;  %s459_s17 = smov [#allocation8]  }
  0x14   :  { %s22_s16 = sshll.u32 %s458_s15, 4  ;;  %s45_s18 = sshll.u32 %s459_s17, 4  ;;  %s23_s16 = int_to_ptr.vmem [resolvable:$true] %s22_s16  ;;  %s46_s18 = int_to_ptr.vmem [resolvable:$true] %s45_s18 }
  0x15   :  { %s383_s21 = scalar_lea.hbm %s573_s0, 128 }
  0x16   :  { %p384_p8 = scmp.ne.s32.totalorder %s573_s0, %s383_s21  ;;  %p387_p9 = scmp.lt.u32.totalorder %s383_s21, %s573_s0 }
  0x18   :  { %p389_p10 = pnand %p387_p9, %p384_p8 }
  0x1a   :  { %392 = shalt.err (!%p389_p10)
}
  0x1b   :  { %s393_s1 = scalar_lea.vmem %s23_s16, 128  ;;  %p398_p12 = scmp.lt.s32.totalorder %s23_s16, %s23_s16 }
  0x1c   :  { %p394_p11 = scmp.ne.s32.totalorder %s23_s16, %s393_s1  ;;  %p399_p13 = scmp.lt.s32.totalorder %s393_s1, %s393_s1 }
  0x1e   :  { %p400_p0 = por %p399_p13, %p398_p12 }
  0x20   :  { %p401_p1 = pnand %p400_p0, %p394_p11 }
  0x22   :  { %404 = shalt.err (!%p401_p1)
}
  0x23   :  { %25 = dma.hbm_to_vmem [thread:$0]  %s573_s0, 128, %s23_s16, [#allocation4]  }
  0x24   :  { %s405_s30 = scalar_lea.hbm %s576_s3, 512 }
  0x25   :  { %p406_p2 = scmp.ne.s32.totalorder %s576_s3, %s405_s30  ;;  %p409_p3 = scmp.lt.u32.totalorder %s405_s30, %s576_s3 }
  0x27   :  { %p411_p4 = pnand %p409_p3, %p406_p2 }
  0x29   :  { %414 = shalt.err (!%p411_p4)
}
  0x2a   :  { %s415_s14 = scalar_lea.vmem %s46_s18, 512  ;;  %p420_p6 = scmp.lt.s32.totalorder %s46_s18, %s46_s18 }
  0x2b   :  { %p416_p5 = scmp.ne.s32.totalorder %s46_s18, %s415_s14  ;;  %p421_p7 = scmp.lt.s32.totalorder %s415_s14, %s415_s14 }
  0x2d   :  { %p422_p8 = por %p421_p7, %p420_p6 }
  0x2f   :  { %p423_p9 = pnand %p422_p8, %p416_p5 }
  0x31   :  { %426 = shalt.err (!%p423_p9)
}
  0x32   :  { %51 = dma.hbm_to_vmem [thread:$0]  %s576_s3, 512, %s46_s18, [#allocation7], %s456_s11, %s456_s11, %s457_s12  }
  0x33   :  { %449 = dma.done.wait [#allocation4], 128  }
  0x34   :  { %450 = vsyncadd [#allocation4], 4294967168 }
  0x35   :  { %451 = dma.done.wait [#allocation7], 1024  }
  0x36   :  { %452 = vsyncadd [#allocation7], 4294966272  ;;  %v460_v0 = vmov 0.0|0.0   ;;  %vm461_vm0 = vmmov 0   ;;  %v462_v1 = vmov 0.0   ;;  %v68_v2 = vld [vmem:[#allocation6] sm:$0xff]  ;;  %v251_v28 = vstv %s579_s6 }
  0x37   :  { %340 = vmatprep.subr.bf16.mxu0 %v460_v0  ;;  %326 = vmatprep.mubr.msk.f32.mxu0 %vm461_vm0, %v462_v1  ;;  %v69_v3 = vld [vmem:[#allocation6 + $0x8] sm:$0xff]  ;;  %v70_v4 = vld [vmem:[#allocation6 + $0x10] sm:$0xff]  ;;  %v71_v6 = vld [vmem:[#allocation6 + $0x18] sm:$0xff]  ;;  %vm84_vm1 = vcmask 261120   ;;  %vm285_vm2 = vcmask 57344  }
  0x38   :  { %346 = vmatprep.subr.bf16.mxu1 %v460_v0  ;;  %337 = vmatprep.mubr.msk.f32.mxu1 %vm461_vm0, %v462_v1  ;;  %v341_v5 = vpack.c.bf16 %v69_v3, %v68_v2  ;;  %v73_v7 = vld [vmem:[#allocation8] sm:$0xff]  ;;  %v74_v8 = vld [vmem:[#allocation8 + $0x8] sm:$0xff]  ;;  %v344_v9 = vpack.c.bf16 %v71_v6, %v70_v4  ;;  %v67_v11 = vld [vmem:[#allocation3] sm:$0xff] }
  0x39   :  { %v347_v10 = vpack.c.bf16 %v74_v8, %v73_v7  ;;  %v75_v12 = vld [vmem:[#allocation8 + $0x10] sm:$0xff]  ;;  %v76_v13 = vld [vmem:[#allocation8 + $0x18] sm:$0xff] }
  0x3a   :  { %342 = vmatpush3.bf16.msra.mxu0 %v341_v5  ;;  %v350_v14 = vpack.c.bf16 %v76_v13, %v75_v12  ;;  %v303_v15 = vld [vmem:[%s575_s2] ss:$0 sm:$0xff] }
  0x3b   :  { %343 = vmatprep.subr.bf16.mxu0 %v460_v0  ;;  %348 = vmatpush3.bf16.msra.mxu1 %v347_v10  ;;  %v305_v20 = vld [vmem:[%s577_s4] ss:$0 sm:$0xff]  ;;  %s463_s4 = smov [#allocation9]  }
  0x3c   :  { %349 = vmatprep.subr.bf16.mxu1 %v460_v0  ;;  %v307_v24 = vld [vmem:[%s578_s5] ss:$0 sm:$0xff]  ;;  %s293_s20 = sshll.u32 %s463_s4, 4  ;;  %s294_s20 = int_to_ptr.vmem [resolvable:$true] %s293_s20 }
  0x3d   :  { %s427_s21 = scalar_lea.vmem %s294_s20, 16  ;;  %s431_s5 = scalar_lea.vmem %s294_s20, 32 }
  0x3e   :  { %345 = vmatpush3.bf16.msra.mxu0 %v344_v9  ;;  %p428_p10 = scmp.ne.s32.totalorder %s294_s20, %s427_s21  ;;  %p432_p11 = scmp.lt.s32.totalorder %s294_s20, %s294_s20 }
  0x3f   :  { %351 = vmatpush3.bf16.msra.mxu1 %v350_v14  ;;  %p433_p12 = scmp.lt.s32.totalorder %s431_s5, %s427_s21 }
  0x41   :  { %327 = vmatmul.mubr.msk.f32.vlgmr.msra.gmra.mrb[0].mxu0 %vm84_vm1, %v67_v11  ;;  %p434_p13 = por %p433_p12, %p432_p11 }
  0x43   :  { %p435_p0 = pnand %p434_p13, %p428_p10 }
 0x114   :  { %v154_v16 = vpop.f32.mrb[0].mxu0 }
 0x115   :  { %v155_v17 = vadd.f32 %v303_v15, %v154_v16  ;;  %v328_v18 = vpop.f32.mrb[1].mxu0 }
 0x117   :  { %v158_v19 = vmax.f32 %v155_v17, 0.0 }
 0x119   :  { %338 = vmatmul.mubr.msk.f32.vlgmr.msra.gmra.mrb[0].mxu1 %vm84_vm1, %v158_v19 }
 0x1ec   :  { %v234_v21 = vpop.f32.mrb[0].mxu1 }
 0x1ed   :  { %v235_v22 = vadd.f32 %v305_v20, %v234_v21  ;;  %v339_v23 = vpop.f32.mrb[1].mxu1 }
 0x1ef   :  { %v238_v25 = vmax.f32 %v235_v22, 0.0 }
 0x1f1   :  { %v247_v26 = vmul.f32 %v307_v24, %v238_v25 }
 0x1f3   :  { %v248_v27 = vsel %vm84_vm1, %v247_v26, 0.0 }
 0x1f4   :  { %249 = vadd.xlane.f32.xlu0 %v248_v27 }
 0x281   :  { %v250_v29 = vpop.xlane.xlu0 %249 }
 0x282   :  { %v252_v30 = vadd.f32 %v251_v28, %v250_v29 }
 0x284   :  { %253 = vxpose.xlu0.b32.start.end [1/1] (short) (narrow) %v252_v30, 8 }
 0x304   :  { %v269_v31 = vpop.trf.xlu0 }
 0x305   :  { %286 = vst.msk [vmem:[#allocation9] sm:$0x1] %vm285_vm2, %v269_v31 }
 0x306   :  { %438 = shalt.err (!%p435_p0)
}
 0x307   :  { %s439_s6 = scalar_lea.hbm %s580_s7, 16 }
 0x308   :  { %p440_p1 = scmp.ne.s32.totalorder %s580_s7, %s439_s6  ;;  %p443_p2 = scmp.lt.u32.totalorder %s439_s6, %s580_s7 }
 0x30a   :  { %p445_p3 = pnand %p443_p2, %p440_p1 }
 0x30c   :  { %448 = shalt.err (!%p445_p3)
}
 0x30d   :  { %296 = dma.vmem_to_hbm [thread:$0]  %s294_s20, 16, %s580_s7, [#allocation5]  }
 0x30e   :  { %453 = dma.done.wait [#allocation5], 16  }
 0x30f   :  { %454 = vsyncadd [#allocation5], 4294967280 }
 0x310   :  { %300 = vsyncpa [#allocation4], 1 }
 0x311   :  { %301 = vsyncpa [#allocation7], 1 }
 0x312   :  { %302 = vsyncpa [#allocation5], 1 }

</bundles_post_ra>
